<compile_context>
chip_gen: v6e
topology: v6e:2x2x1
jax: 0.10.0
libtpu: 0.0.40
codegen_flags: <defaults>
</compile_context>

<pallas_src>
import math

import numpy as np
import jax
import jax.numpy as jnp
from jax.experimental import pallas as pl
from jax.experimental.pallas import tpu as pltpu


# ----------------------------------------------------------------------------
# diffusion schedule (glue: pure numpy, matches cosine_beta_schedule in fp64)
# ----------------------------------------------------------------------------
def make_cosine_schedule(timesteps: int, s: float = 0.008):
    steps = timesteps + 1
    x = np.linspace(0, timesteps, steps, dtype=np.float64)
    alphas_cumprod = np.cos((x / timesteps + s) / (1 + s) * math.pi * 0.5) ** 2
    alphas_cumprod = alphas_cumprod / alphas_cumprod[0]
    betas = 1.0 - alphas_cumprod[1:] / alphas_cumprod[:-1]
    betas = np.clip(betas, 0.0, 0.999)
    alphas = 1.0 - betas
    ac = np.cumprod(alphas)
    return (jnp.asarray(np.sqrt(ac), dtype=jnp.float32),
            jnp.asarray(np.sqrt(1.0 - ac), dtype=jnp.float32))


# ----------------------------------------------------------------------------
# fused kernel.  Grid is (S // stages_per_step,); each program handles one
# chunk of stages over the WHOLE batch (flattened to (B*T, ...)):
#   h          = [x_t | obs_cond] @ [W1; W2] (stacked over stages on N)
#                + bias + t/T                                   (model, pred_x0)
#   out[chunk] = h                                        (lane-dense store)
#   loss_row   = sum_{rows, stages in chunk} (h - x0)^2 * mask    -> (1, C)
# The final  sum(loss_row) / (T*C)  equals  sum_s sum_b mean_{t,c}(l2 * mask).
# ----------------------------------------------------------------------------
def _make_kernel(BT, C, stages_per_step):
    def kernel(xcat_ref,          # (BT, 2C)               bf16
               x0_ref,            # (BT, C)                f32
               tnorm_ref,         # (BT, 1)                f32
               mask_ref,          # (BT, sc*C)             bf16 (0/1)
               w_ref,             # (2C, sc*C)             bf16
               bias_ref,          # (1, sc*C)              f32
               out_ref,           # (BT, sc*C)             f32
               loss_ref):         # (1, 1, C)              f32
        # single fused MXU matmul over the whole stage chunk, K = 2C, N = sc*C
        h = jnp.dot(xcat_ref[...], w_ref[...],
                    preferred_element_type=jnp.float32)          # (BT, sc*C) f32
        h = h + bias_ref[...] + tnorm_ref[...]
        out_ref[...] = h

        # pred_x0 objective, l2 loss with the per-stage 0/1 mask.
        x0 = x0_ref[...]                                          # (BT, C) f32
        mask = mask_ref[...].astype(jnp.float32)                  # f32 elementwise
        acc = jnp.zeros((1, C), jnp.float32)
        for s in range(stages_per_step):                          # static, small
            hs = h[:, s * C:(s + 1) * C]                          # 128-aligned lane slice
            ms = mask[:, s * C:(s + 1) * C]
            d = hs - x0
            acc = acc + jnp.sum(d * d * ms, axis=0, keepdims=True)
        loss_ref[0, :, :] = acc                                   # one lane-dense row

    return kernel


def bit_diffusion_forward(x_0, obs, mask_past, masks_stages, weights, bias,
                          sqrt_ac, sqrt_1m_ac, t, noise, stages_per_step=None):
    """Returns (loss, model_out rearranged 's b t c -> s b c t')."""
    B, T, C = x_0.shape
    S = masks_stages.shape[0]
    BT = B * T
    num_timesteps = sqrt_ac.shape[0]

    if stages_per_step is None:
        stages_per_step = S            # fully collapse the stage grid at toy sizes
    assert S % stages_per_step == 0
    n_chunks = S // stages_per_step

    # --- stage-invariant work hoisted out of the kernel (runs exactly once) ---
    # q_sample: x_t = sqrt(ac)[t] * x0 + sqrt(1-ac)[t] * noise    (extract + mix)
    a = sqrt_ac[t][:, None, None]
    om = sqrt_1m_ac[t][:, None, None]
    x_t = a * x_0 + om * noise
    obs_cond = obs * mask_past
    # self_cond term is identically zero on this path (condition_x0=False) -> dropped.
    xcat = jnp.concatenate([x_t, obs_cond], axis=-1).reshape(BT, 2 * C)
    xcat_bf16 = xcat.astype(jnp.bfloat16)                         # bf16 MXU operand
    x0_flat = x_0.reshape(BT, C)
    t_norm = jnp.repeat(t.astype(jnp.float32) / num_timesteps, T)[:, None]  # (BT, 1)

    # stage-stacked operands: stages laid out along the N (lane) axis
    mask_flat = jnp.transpose(masks_stages, (1, 2, 0, 3)).reshape(BT, S * C)     # bf16
    w_packed = jnp.transpose(weights, (1, 2, 0, 3)).reshape(2 * C, S * C)
    w_packed = w_packed.astype(jnp.bfloat16)                      # halve dominant DMA
    bias_packed = bias.reshape(1, S * C)                          # f32

    kernel = _make_kernel(BT, C, stages_per_step)
    whole2 = lambda c: (0, 0)
    scC = stages_per_step * C

    model_out_flat, loss_rows = pl.pallas_call(
        kernel,
        grid=(n_chunks,),
        in_specs=[
            pl.BlockSpec((BT, 2 * C), whole2),                    # xcat (bf16)
            pl.BlockSpec((BT, C), whole2),                        # x0
            pl.BlockSpec((BT, 1), whole2),                        # t / num_timesteps
            pl.BlockSpec((BT, scC), lambda c: (0, c)),            # stage masks (bf16)
            pl.BlockSpec((2 * C, scC), lambda c: (0, c)),         # [W1; W2] (bf16)
            pl.BlockSpec((1, scC), lambda c: (0, c)),             # bias
        ],
        out_specs=[
            pl.BlockSpec((BT, scC), lambda c: (0, c)),            # model_out
            pl.BlockSpec((1, 1, C), lambda c: (c, 0, 0)),         # partial-loss row
        ],
        out_shape=[
            jax.ShapeDtypeStruct((BT, S * C), jnp.float32),
            jax.ShapeDtypeStruct((n_chunks, 1, C), jnp.float32),
        ],
        compiler_params=pltpu.CompilerParams(
            dimension_semantics=("arbitrary",)),
    )(xcat_bf16, x0_flat, t_norm, mask_flat, w_packed, bias_packed)

    # loss[s] = sum_b mean_{t,c}((h - x0)^2 * mask[s])  summed over stages
    loss = jnp.sum(loss_rows) * (1.0 / float(T * C))
    # 's b t c -> s b c t' rearrange (kept outside: T=16 < 128 would make an
    # in-kernel transposed store lane-sparse; fold in when T >= 128).
    model_out_bct = jnp.transpose(model_out_flat.reshape(B, T, S, C), (2, 0, 3, 1))
    return loss, model_out_bct


# ----------------------------------------------------------------------------
# pure-JAX reference of the same forward (for correctness check)
# ----------------------------------------------------------------------------
def _reference(x_0, obs, mask_past, masks_stages, weights, bias,
               sqrt_ac, sqrt_1m_ac, t, noise):
    hi = jax.lax.Precision.HIGHEST
    a = sqrt_ac[t][:, None, None]
    om = sqrt_1m_ac[t][:, None, None]
    x_t = a * x_0 + om * noise
    obs_cond = obs * mask_past
    tn = (t.astype(jnp.float32) / sqrt_ac.shape[0])[None, :, None, None]
    out = (jnp.einsum('btc,scd->sbtd', x_t, weights[:, 0], precision=hi)
           + jnp.einsum('btc,scd->sbtd', obs_cond, weights[:, 1], precision=hi)
           + bias[:, None, :, :] + tn)
    mask = masks_stages.astype(jnp.float32)
    diff2 = (out - x_0[None]) ** 2
    loss = jnp.sum(jnp.mean(diff2 * mask, axis=(2, 3)))
    return loss, jnp.transpose(out, (0, 1, 3, 2))


if __name__ == "__main__":
    # batch, seq len, channels (lane-dense multiple of 128), num stage masks
    B, T, C, S = 2, 16, 128, 2
    NUM_TIMESTEPS = 1000

    key = jax.random.PRNGKey(0)
    k_x0, k_obs, k_mall, k_mpast, k_w, k_b, k_t, k_noise = jax.random.split(key, 8)

    x_0 = jax.random.normal(k_x0, (B, T, C), dtype=jnp.float32)
    obs = jax.random.normal(k_obs, (B, T, C), dtype=jnp.float32)
    # 0/1 stage masks shipped as bf16 (exact for 0/1)
    masks_stages = (jax.random.uniform(k_mall, (S, B, T, C)) > 0.5).astype(jnp.bfloat16)
    mask_past = (jax.random.uniform(k_mpast, (B, T, 1)) > 0.5).astype(jnp.float32)

    # synthetic deterministic stand-in for the externally injected nn.Module:
    # per-stage linear model  out[s] = x_t @ W1[s] + obs_cond @ W2[s] + bias[s] + t/T
    # TODO(synk): replace with the real model's fused Pallas implementation.
    weights = 0.02 * jax.random.normal(k_w, (S, 2, C, C), dtype=jnp.float32)
    bias = 0.01 * jax.random.normal(k_b, (S, 1, C), dtype=jnp.float32)

    sqrt_ac, sqrt_1m_ac = make_cosine_schedule(NUM_TIMESTEPS)

    # forward(): t ~ randint(0, num_timesteps, (B,)), noise ~ N(0, 1)
    t = jax.random.randint(k_t, (B,), 0, NUM_TIMESTEPS, dtype=jnp.int32)
    noise = jax.random.normal(k_noise, (B, T, C), dtype=jnp.float32)

    loss, model_out_bct = bit_diffusion_forward(
        x_0, obs, mask_past, masks_stages, weights, bias,
        sqrt_ac, sqrt_1m_ac, t, noise)
    jax.block_until_ready((loss, model_out_bct))

    loss_ref, out_ref = _reference(
        x_0, obs, mask_past, masks_stages, weights, bias,
        sqrt_ac, sqrt_1m_ac, t, noise)
    np_loss, np_out = np.asarray(loss), np.asarray(model_out_bct)
    assert np_out.shape == (S, B, C, T)
    assert np.allclose(np_loss, np.asarray(loss_ref), rtol=1e-2, atol=1e-2)
    assert np.allclose(np_out, np.asarray(out_ref), rtol=1e-2, atol=1e-2)

    print("KERNEL_OK")
</pallas_src>

<mosaic_0001>
module attributes {stable_mosaic.version = 11 : i64} {
  func.func @kernel(%arg0: i32, %arg1: memref<32x256xbf16, #tpu.memory_space<vmem>>, %arg2: memref<32x128xf32, #tpu.memory_space<vmem>>, %arg3: memref<32x1xf32, #tpu.memory_space<vmem>>, %arg4: memref<32x256xbf16, #tpu.memory_space<vmem>>, %arg5: memref<256x256xbf16, #tpu.memory_space<vmem>>, %arg6: memref<1x256xf32, #tpu.memory_space<vmem>>, %arg7: memref<32x256xf32, #tpu.memory_space<vmem>>, %arg8: memref<1x1x128xf32, #tpu.memory_space<vmem>>) attributes {dimension_semantics = [#tpu.dimension_semantics<arbitrary>], iteration_bounds = array<i64: 1>, scalar_prefetch = 0 : i64, scratch_operands = 0 : i64, tpu.core_type = #tpu.core_type<tc>, window_params = [{pipeline_mode = #tpu.pipeline_mode<synchronous>, transform_indices = @transform_0, window_bounds = array<i64: 32, 256>}, {pipeline_mode = #tpu.pipeline_mode<synchronous>, transform_indices = @transform_1, window_bounds = array<i64: 32, 128>}, {pipeline_mode = #tpu.pipeline_mode<synchronous>, transform_indices = @transform_2, window_bounds = array<i64: 32, 1>}, {transform_indices = @transform_3, window_bounds = array<i64: 32, 256>}, {transform_indices = @transform_4, window_bounds = array<i64: 256, 256>}, {transform_indices = @transform_5, window_bounds = array<i64: 1, 256>}, {transform_indices = @transform_6, window_bounds = array<i64: 32, 256>}, {transform_indices = @transform_7, window_bounds = array<i64: 1, 1, 128>}]} {
    %c0 = arith.constant 0 : index
    %c0_0 = arith.constant 0 : index
    %0 = vector.load %arg1[%c0, %c0_0] : memref<32x256xbf16, #tpu.memory_space<vmem>>, vector<32x256xbf16>
    %c0_1 = arith.constant 0 : index
    %c0_2 = arith.constant 0 : index
    %1 = vector.load %arg5[%c0_1, %c0_2] : memref<256x256xbf16, #tpu.memory_space<vmem>>, vector<256x256xbf16>
    %cst = arith.constant dense<0.000000e+00> : vector<32x256xf32>
    %2 = tpu.matmul %0, %1, %cst {dimension_numbers = #tpu.dot_dimension_numbers<[1], [0], [0], [1], [0, 0, 1, 1], [], []>} : vector<32x256xbf16>, vector<256x256xbf16>, vector<32x256xf32> -> vector<32x256xf32>
    %c0_3 = arith.constant 0 : index
    %c0_4 = arith.constant 0 : index
    %3 = vector.load %arg6[%c0_3, %c0_4] : memref<1x256xf32, #tpu.memory_space<vmem>>, vector<1x256xf32>
    %4 = vector.broadcast %3 : vector<1x256xf32> to vector<32x256xf32>
    %5 = arith.addf %2, %4 : vector<32x256xf32>
    %c0_5 = arith.constant 0 : index
    %c0_6 = arith.constant 0 : index
    %6 = vector.load %arg3[%c0_5, %c0_6] : memref<32x1xf32, #tpu.memory_space<vmem>>, vector<32x1xf32>
    %7 = vector.broadcast %6 : vector<32x1xf32> to vector<32x256xf32>
    %8 = arith.addf %5, %7 : vector<32x256xf32>
    %c0_7 = arith.constant 0 : index
    %c0_8 = arith.constant 0 : index
    %9 = vector.load %arg7[%c0_7, %c0_8] : memref<32x256xf32, #tpu.memory_space<vmem>>, vector<32x256xf32>
    tpu.vector_store %arg7[%c0_7, %c0_8], %8 {strides = array<i32>} : memref<32x256xf32, #tpu.memory_space<vmem>>, vector<32x256xf32>,
    %c0_9 = arith.constant 0 : index
    %c0_10 = arith.constant 0 : index
    %10 = vector.load %arg2[%c0_9, %c0_10] : memref<32x128xf32, #tpu.memory_space<vmem>>, vector<32x128xf32>
    %c0_11 = arith.constant 0 : index
    %c0_12 = arith.constant 0 : index
    %11 = vector.load %arg4[%c0_11, %c0_12] : memref<32x256xbf16, #tpu.memory_space<vmem>>, vector<32x256xbf16>
    %12 = arith.extf %11 : vector<32x256xbf16> to vector<32x256xf32>
    %cst_13 = arith.constant 0.000000e+00 : f32
    %13 = vector.broadcast %cst_13 : f32 to vector<1x128xf32>
    %14 = vector.extract_strided_slice %8 {offsets = [0, 0], sizes = [32, 128], strides = [1, 1]} : vector<32x256xf32> to vector<32x128xf32>
    %15 = vector.extract_strided_slice %12 {offsets = [0, 0], sizes = [32, 128], strides = [1, 1]} : vector<32x256xf32> to vector<32x128xf32>
    %16 = arith.subf %14, %10 : vector<32x128xf32>
    %17 = arith.mulf %16, %16 : vector<32x128xf32>
    %18 = arith.mulf %17, %15 : vector<32x128xf32>
    %cst_14 = arith.constant dense<0.000000e+00> : vector<128xf32>
    %19 = vector.multi_reduction <add>, %18, %cst_14 [0] : vector<32x128xf32> to vector<128xf32>
    %20 = vector.shape_cast %19 : vector<128xf32> to vector<1x128xf32>
    %21 = arith.addf %13, %20 : vector<1x128xf32>
    %22 = vector.extract_strided_slice %8 {offsets = [0, 128], sizes = [32, 128], strides = [1, 1]} : vector<32x256xf32> to vector<32x128xf32>
    %23 = vector.extract_strided_slice %12 {offsets = [0, 128], sizes = [32, 128], strides = [1, 1]} : vector<32x256xf32> to vector<32x128xf32>
    %24 = arith.subf %22, %10 : vector<32x128xf32>
    %25 = arith.mulf %24, %24 : vector<32x128xf32>
    %26 = arith.mulf %25, %23 : vector<32x128xf32>
    %cst_15 = arith.constant dense<0.000000e+00> : vector<128xf32>
    %27 = vector.multi_reduction <add>, %26, %cst_15 [0] : vector<32x128xf32> to vector<128xf32>
    %28 = vector.shape_cast %27 : vector<128xf32> to vector<1x128xf32>
    %29 = arith.addf %21, %28 : vector<1x128xf32>
    %c0_16 = arith.constant 0 : index
    %c0_17 = arith.constant 0 : index
    %c0_18 = arith.constant 0 : index
    %30 = vector.load %arg8[%c0_16, %c0_17, %c0_18] : memref<1x1x128xf32, #tpu.memory_space<vmem>>, vector<1x1x128xf32>
    %31 = vector.shape_cast %30 : vector<1x1x128xf32> to vector<1x128xf32>
    %32 = vector.shape_cast %29 : vector<1x128xf32> to vector<1x1x128xf32>
    tpu.vector_store %arg8[%c0_16, %c0_17, %c0_18], %32 {strides = array<i32>} : memref<1x1x128xf32, #tpu.memory_space<vmem>>, vector<1x1x128xf32>,
    return
  }
  func.func @transform_0(%arg0: i32) -> (i32, i32) {
    %c0_i32 = arith.constant 0 : i32
    %c0_i32_0 = arith.constant 0 : i32
    %c0_i32_1 = arith.constant 0 : i32
    return %c0_i32, %c0_i32_0 : i32, i32
  }
  func.func @transform_1(%arg0: i32) -> (i32, i32) {
    %c0_i32 = arith.constant 0 : i32
    %c0_i32_0 = arith.constant 0 : i32
    %c0_i32_1 = arith.constant 0 : i32
    return %c0_i32, %c0_i32_0 : i32, i32
  }
  func.func @transform_2(%arg0: i32) -> (i32, i32) {
    %c0_i32 = arith.constant 0 : i32
    %c0_i32_0 = arith.constant 0 : i32
    %c0_i32_1 = arith.constant 0 : i32
    return %c0_i32, %c0_i32_0 : i32, i32
  }
  func.func @transform_3(%arg0: i32) -> (i32, i32) {
    %c0_i32 = arith.constant 0 : i32
    %c0_i32_0 = arith.constant 0 : i32
    return %c0_i32, %arg0 : i32, i32
  }
  func.func @transform_4(%arg0: i32) -> (i32, i32) {
    %c0_i32 = arith.constant 0 : i32
    %c0_i32_0 = arith.constant 0 : i32
    return %c0_i32, %arg0 : i32, i32
  }
  func.func @transform_5(%arg0: i32) -> (i32, i32) {
    %c0_i32 = arith.constant 0 : i32
    %c0_i32_0 = arith.constant 0 : i32
    return %c0_i32, %arg0 : i32, i32
  }
  func.func @transform_6(%arg0: i32) -> (i32, i32) {
    %c0_i32 = arith.constant 0 : i32
    %c0_i32_0 = arith.constant 0 : i32
    return %c0_i32, %arg0 : i32, i32
  }
  func.func @transform_7(%arg0: i32) -> (i32, i32, i32) {
    %c0_i32 = arith.constant 0 : i32
    %c0_i32_0 = arith.constant 0 : i32
    %c0_i32_1 = arith.constant 0 : i32
    return %arg0, %c0_i32, %c0_i32_0 : i32, i32, i32
  }
}

</mosaic_0001>

<bundles_post_ra>
// kernel: tpu_custom_call.1
= control target key start
LH: loop header
LB: loop body
LE: loop exit
PB: predicated region body
PF: predicated region fallthrough
CT: control target
= control target key end

     0   :  { %13 = vsyncpa [#allocation3], 0  ;;  %s816_s0 = inlined_call_operand.vmem [shape: bf16[32,256], index: 0, kind: input, shape index: {}]   ;;  %s817_s1 = inlined_call_operand.hbm [shape: f32[32,128], index: 1, kind: input, shape index: {}]   ;;  %s818_s2 = inlined_call_operand.vmem [shape: f32[32,1], index: 2, kind: input, shape index: {}]   ;;  %s819_s3 = inlined_call_operand.hbm [shape: bf16[32,256], index: 3, kind: input, shape index: {}]   ;;  %s820_s4 = inlined_call_operand.hbm [shape: bf16[256,256], index: 4, kind: input, shape index: {}]   ;;  %s821_s5 = inlined_call_operand.vmem [shape: f32[1,256], index: 5, kind: input, shape index: {}]   ;;  %s822_s6 = inlined_call_operand.hbm [shape: f32[32,256], index: 6, kind: output, shape index: {0}]   ;;  %s823_s7 = inlined_call_operand.hbm [shape: f32[1,1,128], index: 7, kind: output, shape index: {1}]  }
   0x1   :  { %14 = vsyncpa [#allocation6], 0 }
   0x2   :  { %15 = vsyncpa [#allocation4], 0 }
   0x3   :  { %16 = vsyncpa [#allocation10], 0  ;;  %s724_s24 = smov [#allocation5]   ;;  %s725_s26 = smov [#allocation2]  }
   0x4   :  { %s38_s25 = sshll.u32 %s724_s24, 4  ;;  %s24_s27 = sshll.u32 %s725_s26, 4  ;;  %s39_s25 = int_to_ptr.vmem [resolvable:$true] %s38_s25  ;;  %s25_s27 = int_to_ptr.vmem [resolvable:$true] %s24_s27 }
   0x5   :  { %s624_s28 = scalar_lea.vmem %s39_s25, 512  ;;  %p629_p1 = scmp.lt.s32.totalorder %s39_s25, %s39_s25 }
   0x6   :  { %p625_p0 = scmp.ne.s32.totalorder %s39_s25, %s624_s28  ;;  %p630_p2 = scmp.lt.s32.totalorder %s624_s28, %s624_s28 }
   0x8   :  { %p631_p3 = por %p630_p2, %p629_p1 }
   0xa   :  { %p632_p4 = pnand %p631_p3, %p625_p0 }
   0xc   :  { %635 = shalt.err (!%p632_p4)
}
   0xd   :  { %s726_s29 = smov 128   ;;  %s727_s30 = smov 8  }
   0xe   :  { %44 = dma.hbm_to_vmem [thread:$0]  %s819_s3, 512, %s39_s25, [#allocation6], %s726_s29, %s726_s29, %s727_s30  }
   0xf   :  { %s644_s10 = scalar_lea.vmem %s25_s27, 512  ;;  %p649_p6 = scmp.lt.s32.totalorder %s25_s27, %s25_s27 }
  0x10   :  { %p645_p5 = scmp.ne.s32.totalorder %s25_s27, %s644_s10  ;;  %p650_p7 = scmp.lt.s32.totalorder %s644_s10, %s644_s10 }
  0x12   :  { %p651_p8 = por %p650_p7, %p649_p6 }
  0x14   :  { %p652_p9 = pnand %p651_p8, %p645_p5 }
  0x16   :  { %655 = shalt.err (!%p652_p9)
}
  0x17   :  { %30 = dma.hbm_to_vmem [thread:$0]  %s817_s1, 512, %s25_s27, [#allocation3], %s726_s29, %s726_s29, %s727_s30  }
  0x18   :  { %s728_s13 = smov [#allocation7]  }
  0x19   :  { %s50_s14 = sshll.u32 %s728_s13, 4  ;;  %s51_s14 = int_to_ptr.vmem [resolvable:$true] %s50_s14 }
  0x1a   :  { %s664_s15 = scalar_lea.vmem %s51_s14, 4096  ;;  %p669_p11 = scmp.lt.s32.totalorder %s51_s14, %s51_s14 }
  0x1b   :  { %p665_p10 = scmp.ne.s32.totalorder %s51_s14, %s664_s15  ;;  %p670_p12 = scmp.lt.s32.totalorder %s664_s15, %s664_s15 }
  0x1d   :  { %p671_p13 = por %p670_p12, %p669_p11 }
  0x1f   :  { %p672_p0 = pnand %p671_p13, %p665_p10 }
  0x21   :  { %675 = shalt.err (!%p672_p0)
}
  0x22   :  { %56 = dma.hbm_to_vmem [thread:$0]  %s820_s4, 4096, %s51_s14, [#allocation6], %s726_s29, %s726_s29, %s727_s30  }
  0x23   :  { %716 = dma.done.wait [#allocation3], 512  }
  0x24   :  { %717 = vsyncadd [#allocation3], 4294966784 }
  0x25   :  { %718 = dma.done.wait [#allocation6], 4608  }
  0x26   :  { %719 = vsyncadd [#allocation6], 4294962688  ;;  %v729_v0 = vmov 0   ;;  %v562_v1 = vld [vmem:[#allocation7 + $0x74] ss:$8 sps:$4 sm:$0xff]   ;;  %v349_v18 = vld [vmem:[%s818_s2] sm:$0xff]  ;;  %v106_v41 = vlaneseq }
  0x27   :  { %560 = vset.pattern.permute.xlu0 %v729_v0  ;;  %561 = vset.pattern.permute.xlu1 %v729_v0  ;;  %v564_v2 = vld [vmem:[#allocation7 + $0x70] ss:$8 sps:$4 sm:$0xff]   ;;  %v565_v3 = vld [vmem:[#allocation7 + $0x64] ss:$8 sps:$4 sm:$0xff]   ;;  %v567_v4 = vld [vmem:[#allocation7 + $0x60] ss:$8 sps:$4 sm:$0xff]  }
  0x28   :  { %296 = vmatprep.subr.bf16.mxu0 %v562_v1  ;;  %518 = vmatprep.subr.bf16.mxu1 %v562_v1  ;;  %v568_v5 = vld [vmem:[#allocation7 + $0x54] ss:$8 sps:$4 sm:$0xff]   ;;  %v570_v6 = vld [vmem:[#allocation7 + $0x50] ss:$8 sps:$4 sm:$0xff]   ;;  %v571_v7 = vld [vmem:[#allocation7 + $0x44] ss:$8 sps:$4 sm:$0xff]  }
  0x29   :  { %297 = vmatpush1.bf16.msra.mxu0 %v564_v2  ;;  %534 = vmatpush1.bf16.msra.mxu1 %v564_v2  ;;  %v573_v8 = vld [vmem:[#allocation7 + $0x40] ss:$8 sps:$4 sm:$0xff]   ;;  %v574_v9 = vld [vmem:[#allocation7 + $0x34] ss:$8 sps:$4 sm:$0xff]   ;;  %v576_v10 = vld [vmem:[#allocation7 + $0x30] ss:$8 sps:$4 sm:$0xff]  }
  0x2a   :  { %298 = vmatprep.subr.bf16.mxu0 %v565_v3  ;;  %519 = vmatprep.subr.bf16.mxu1 %v565_v3  ;;  %v577_v11 = vld [vmem:[#allocation7 + $0x24] ss:$8 sps:$4 sm:$0xff]   ;;  %v579_v12 = vld [vmem:[#allocation7 + $0x20] ss:$8 sps:$4 sm:$0xff]   ;;  %v580_v13 = vld [vmem:[#allocation7 + $0x14] ss:$8 sps:$4 sm:$0xff]  }
  0x2b   :  { %v612_v14 = vld [vmem:[%s816_s0 + $0x4] ss:$8 sps:$4 sm:$0xff]   ;;  %v582_v15 = vld [vmem:[#allocation7 + $0x10] ss:$8 sps:$4 sm:$0xff]   ;;  %v615_v16 = vld [vmem:[%s816_s0 + $0x14] ss:$8 sps:$4 sm:$0xff]   ;;  %355 = vperm.xlu0 %560, %v349_v18  }
  0x2c   :  { %v583_v17 = vld [vmem:[#allocation7 + $0x4] ss:$8 sps:$4 sm:$0xff]   ;;  %v351_v19 = vld [vmem:[%s818_s2 + $0x10] sm:$0xff]  ;;  %328 = vmatprep.mubr.bf16.mxu0 %v612_v14  ;;  %338 = vmatprep.mubr.bf16.mxu1 %v615_v16  ;;  %v585_v20 = vld [vmem:[#allocation7] ss:$8 sps:$4 sm:$0xff]   ;;  %v107_v42 = vshrl.u32 %v106_v41, 7 }
  0x2d   :  { %299 = vmatpush1.bf16.msra.mxu0 %v567_v4  ;;  %535 = vmatpush1.bf16.msra.mxu1 %v567_v4  ;;  %v350_v21 = vld [vmem:[%s818_s2 + $0x8] sm:$0xff]  ;;  %v352_v22 = vld [vmem:[%s818_s2 + $0x18] sm:$0xff]  ;;  %v104_v44 = vld [vmem:[%s821_s5] sm:$0x3] }
  0x2e   :  { %300 = vmatprep.subr.bf16.mxu0 %v568_v5  ;;  %520 = vmatprep.subr.bf16.mxu1 %v568_v5  ;;  %v586_v23 = vld [vmem:[#allocation7 + $0xf4] ss:$8 sps:$4 sm:$0xff]   ;;  %v588_v24 = vld [vmem:[#allocation7 + $0xf0] ss:$8 sps:$4 sm:$0xff]   ;;  %v589_v25 = vld [vmem:[#allocation7 + $0xe4] ss:$8 sps:$4 sm:$0xff]  }
  0x2f   :  { %365 = vperm.xlu1 %561, %v351_v19   ;;  %360 = vperm.xlu0 %560, %v350_v21   ;;  %v591_v26 = vld [vmem:[#allocation7 + $0xe0] ss:$8 sps:$4 sm:$0xff]   ;;  %v592_v27 = vld [vmem:[#allocation7 + $0xd4] ss:$8 sps:$4 sm:$0xff]   ;;  %v594_v28 = vld [vmem:[#allocation7 + $0xd0] ss:$8 sps:$4 sm:$0xff]  }
  0x30   :  { %v595_v29 = vld [vmem:[#allocation7 + $0xc4] ss:$8 sps:$4 sm:$0xff]   ;;  %v597_v30 = vld [vmem:[#allocation7 + $0xc0] ss:$8 sps:$4 sm:$0xff]   ;;  %v598_v31 = vld [vmem:[#allocation7 + $0xb4] ss:$8 sps:$4 sm:$0xff]  }
  0x31   :  { %301 = vmatpush1.bf16.msra.mxu0 %v570_v6  ;;  %536 = vmatpush1.bf16.msra.mxu1 %v570_v6  ;;  %v600_v32 = vld [vmem:[#allocation7 + $0xb0] ss:$8 sps:$4 sm:$0xff]   ;;  %v601_v33 = vld [vmem:[#allocation7 + $0xa4] ss:$8 sps:$4 sm:$0xff]   ;;  %v603_v34 = vld [vmem:[#allocation7 + $0xa0] ss:$8 sps:$4 sm:$0xff]  }
  0x32   :  { %302 = vmatprep.subr.bf16.mxu0 %v571_v7  ;;  %521 = vmatprep.subr.bf16.mxu1 %v571_v7  ;;  %v604_v35 = vld [vmem:[#allocation7 + $0x94] ss:$8 sps:$4 sm:$0xff]   ;;  %v606_v36 = vld [vmem:[#allocation7 + $0x90] ss:$8 sps:$4 sm:$0xff]   ;;  %v607_v37 = vld [vmem:[#allocation7 + $0x84] ss:$8 sps:$4 sm:$0xff]  }
  0x33   :  { %370 = vperm.xlu1 %561, %v352_v22   ;;  %v609_v38 = vld [vmem:[#allocation7 + $0x80] ss:$8 sps:$4 sm:$0xff]   ;;  %v613_v40 = vld [vmem:[%s816_s0 + $0x10] ss:$8 sps:$4 sm:$0xff]   ;;  %v108_v43 = vsub.s32 0, %v107_v42  ;;  %v112_v45 = vsub.s32 1, %v107_v42 }
  0x34   :  { %v610_v39 = vld [vmem:[%s816_s0] ss:$8 sps:$4 sm:$0xff]   ;;  %v391_v61 = vld [vmem:[#allocation2 + $0x10] sm:$0xff]  ;;  %v392_v14 = vld [vmem:[#allocation2 + $0x18] sm:$0xff]  ;;  %s730_s0 = smov [#allocation8]  }
  0x35   :  { %303 = vmatpush1.bf16.msra.mxu0 %v573_v8  ;;  %537 = vmatpush1.bf16.msra.mxu1 %v573_v8  ;;  %v109_v46 = vrot.slane %v104_v44, %v108_v43  ;;  %v113_v48 = vrot.slane %v104_v44, %v112_v45  ;;  %v389_v54 = vld [vmem:[#allocation2] sm:$0xff]  ;;  %v394_v6 = vld [vmem:[#allocation5 + $0x8] sm:$0xff]  ;;  %s455_s5 = sshll.u32 %s730_s0, 4  ;;  %s456_s5 = int_to_ptr.vmem [resolvable:$true] %s455_s5 }
  0x36   :  { %304 = vmatprep.subr.bf16.mxu0 %v574_v9  ;;  %522 = vmatprep.subr.bf16.mxu1 %v574_v9  ;;  %v393_v4 = vld [vmem:[#allocation5] sm:$0xff]  ;;  %s676_s9 = scalar_lea.vmem %s456_s5, 1024  ;;  %p681_p2 = scmp.lt.s32.totalorder %s456_s5, %s456_s5 }
  0x37   :  { %p677_p1 = scmp.ne.s32.totalorder %s456_s5, %s676_s9  ;;  %p682_p3 = scmp.lt.s32.totalorder %s676_s9, %s676_s9 }
  0x39   :  { %305 = vmatpush1.bf16.msra.mxu0 %v576_v10  ;;  %538 = vmatpush1.bf16.msra.mxu1 %v576_v10  ;;  %p683_p4 = por %p682_p3, %p681_p2 }
  0x3a   :  { %306 = vmatprep.subr.bf16.mxu0 %v577_v11  ;;  %523 = vmatprep.subr.bf16.mxu1 %v577_v11 }
  0x3b   :  { %p684_p5 = pnand %p683_p4, %p677_p1 }
  0x3d   :  { %307 = vmatpush1.bf16.msra.mxu0 %v579_v12  ;;  %539 = vmatpush1.bf16.msra.mxu1 %v579_v12 }
  0x3e   :  { %308 = vmatprep.subr.bf16.mxu0 %v580_v13  ;;  %524 = vmatprep.subr.bf16.mxu1 %v580_v13  ;;  %v390_v13 = vld [vmem:[#allocation2 + $0x8] sm:$0xff] }
  0x41   :  { %309 = vmatpush1.bf16.msra.mxu0 %v582_v15  ;;  %540 = vmatpush1.bf16.msra.mxu1 %v582_v15  ;;  %v395_v15 = vld [vmem:[#allocation5 + $0x10] sm:$0xff] }
  0x42   :  { %310 = vmatprep.subr.bf16.mxu0 %v583_v17  ;;  %525 = vmatprep.subr.bf16.mxu1 %v583_v17 }
  0x45   :  { %311 = vmatpush1.bf16.msra.mxu0 %v585_v20  ;;  %541 = vmatpush1.bf16.msra.mxu1 %v585_v20  ;;  %v397_v20 = vunpack.c.l.bf16 %v393_v4 }
  0x46   :  { %312 = vmatprep.subr.bf16.mxu0 %v586_v23  ;;  %526 = vmatprep.subr.bf16.mxu1 %v586_v23  ;;  %v399_v23 = vunpack.c.l.bf16 %v394_v6 }
  0x49   :  { %313 = vmatpush2.bf16.msra.mxu0 %v588_v24  ;;  %542 = vmatpush2.bf16.msra.mxu1 %v588_v24 }
  0x4a   :  { %314 = vmatprep.subr.bf16.mxu0 %v589_v25  ;;  %527 = vmatprep.subr.bf16.mxu1 %v589_v25  ;;  %v396_v25 = vld [vmem:[#allocation5 + $0x18] sm:$0xff] }
  0x4d   :  { %315 = vmatpush2.bf16.msra.mxu0 %v591_v26  ;;  %543 = vmatpush2.bf16.msra.mxu1 %v591_v26 }
  0x4e   :  { %316 = vmatprep.subr.bf16.mxu0 %v592_v27  ;;  %528 = vmatprep.subr.bf16.mxu1 %v592_v27 }
  0x51   :  { %317 = vmatpush2.bf16.msra.mxu0 %v594_v28  ;;  %544 = vmatpush2.bf16.msra.mxu1 %v594_v28 }
  0x52   :  { %318 = vmatprep.subr.bf16.mxu0 %v595_v29  ;;  %529 = vmatprep.subr.bf16.mxu1 %v595_v29  ;;  %v401_v29 = vunpack.c.l.bf16 %v395_v15 }
  0x55   :  { %319 = vmatpush2.bf16.msra.mxu0 %v597_v30  ;;  %545 = vmatpush2.bf16.msra.mxu1 %v597_v30 }
  0x56   :  { %320 = vmatprep.subr.bf16.mxu0 %v598_v31  ;;  %530 = vmatprep.subr.bf16.mxu1 %v598_v31  ;;  %v398_v31 = vunpack.c.h.bf16 %v393_v4 }
  0x59   :  { %321 = vmatpush2.bf16.msra.mxu0 %v600_v32  ;;  %546 = vmatpush2.bf16.msra.mxu1 %v600_v32  ;;  %v400_v32 = vunpack.c.h.bf16 %v394_v6 }
  0x5a   :  { %322 = vmatprep.subr.bf16.mxu0 %v601_v33  ;;  %531 = vmatprep.subr.bf16.mxu1 %v601_v33 }
  0x5d   :  { %323 = vmatpush2.bf16.msra.mxu0 %v603_v34  ;;  %547 = vmatpush2.bf16.msra.mxu1 %v603_v34 }
  0x5e   :  { %324 = vmatprep.subr.bf16.mxu0 %v604_v35  ;;  %532 = vmatprep.subr.bf16.mxu1 %v604_v35 }
  0x61   :  { %325 = vmatpush2.bf16.msra.mxu0 %v606_v36  ;;  %548 = vmatpush2.bf16.msra.mxu1 %v606_v36 }
  0x62   :  { %326 = vmatprep.subr.bf16.mxu0 %v607_v37  ;;  %533 = vmatprep.subr.bf16.mxu1 %v607_v37 }
  0x65   :  { %327 = vmatpush2.bf16.msra.mxu0 %v609_v38  ;;  %549 = vmatpush2.bf16.msra.mxu1 %v609_v38  ;;  %v402_v38 = vunpack.c.h.bf16 %v395_v15 }
  0x68   :  { %329 = vmatmul.mubr.bf16.vlgmr.msra.gmra.mxu0 %v610_v39  ;;  %339 = vmatmul.mubr.bf16.vlgmr.msra.gmra.mxu1 %v613_v40  ;;  %v403_v39 = vunpack.c.l.bf16 %v396_v25 }
  0xa6   :  { %v356_v51 = vpop.permute.xlu0 %355 }
  0xaa   :  { %v366_v47 = vpop.permute.xlu1 %365  ;;  %v361_v12 = vpop.permute.xlu0 %360 }
  0xae   :  { %v371_v3 = vpop.permute.xlu1 %370 }
 0x128   :  { %v330_v49 = vpop.f32.mrf.mxu0  ;;  %v340_v50 = vpop.f32.mrf.mxu1 }
 0x129   :  { %v331_v52 = vadd.f32 %v330_v49, %v109_v46  ;;  %v341_v53 = vadd.f32 %v340_v50, %v109_v46 }
 0x12a   :  { %v332_v55 = vpop.f32.mrf.mxu0  ;;  %v342_v56 = vpop.f32.mrf.mxu1 }
 0x12b   :  { %v373_v57 = vadd.f32 %v356_v51, %v331_v52  ;;  %v377_v58 = vadd.f32 %v366_v47, %v341_v53  ;;  %v333_v59 = vadd.f32 %v332_v55, %v113_v48  ;;  %v343_v60 = vadd.f32 %v342_v56, %v113_v48 }
 0x12c   :  { %v334_v62 = vpop.f32.mrf.mxu0  ;;  %v344_v63 = vpop.f32.mrf.mxu1 }
 0x12d   :  { %381 = vst [vmem:[#allocation8] sm:$0xff] %v373_v57  ;;  %v405_v0 = vsub.f32 %v373_v57, %v389_v54  ;;  %385 = vst [vmem:[#allocation8 + $0x20] sm:$0xff] %v377_v58  ;;  %v374_v1 = vadd.f32 %v356_v51, %v333_v59  ;;  %v378_v2 = vadd.f32 %v366_v47, %v343_v60 }
 0x12e   :  { %v335_v5 = vadd.f32 %v334_v62, %v109_v46  ;;  %v345_v7 = vadd.f32 %v344_v63, %v109_v46  ;;  %v336_v8 = vpop.f32.mrf.mxu0  ;;  %v346_v9 = vpop.f32.mrf.mxu1  ;;  %v407_v10 = vsub.f32 %v377_v58, %v391_v61 }
 0x12f   :  { %382 = vst [vmem:[#allocation8 + $0x8] sm:$0xff] %v374_v1  ;;  %v427_v11 = vsub.f32 %v374_v1, %v389_v54  ;;  %386 = vst [vmem:[#allocation8 + $0x28] sm:$0xff] %v378_v2  ;;  %v337_v18 = vadd.f32 %v336_v8, %v113_v48  ;;  %v347_v19 = vadd.f32 %v346_v9, %v113_v48 }
 0x130   :  { %v375_v16 = vadd.f32 %v361_v12, %v335_v5  ;;  %v379_v17 = vadd.f32 %v371_v3, %v345_v7  ;;  %v409_v21 = vmul.f32 %v405_v0, %v405_v0  ;;  %v429_v22 = vsub.f32 %v378_v2, %v391_v61 }
 0x131   :  { %v376_v27 = vadd.f32 %v361_v12, %v337_v18  ;;  %v380_v28 = vadd.f32 %v371_v3, %v347_v19  ;;  %v411_v30 = vmul.f32 %v407_v10, %v407_v10  ;;  %v431_v33 = vmul.f32 %v427_v11, %v427_v11 }
 0x132   :  { %383 = vst [vmem:[#allocation8 + $0x10] sm:$0xff] %v375_v16  ;;  %v406_v24 = vsub.f32 %v375_v16, %v390_v13  ;;  %387 = vst [vmem:[#allocation8 + $0x30] sm:$0xff] %v379_v17  ;;  %v408_v26 = vsub.f32 %v379_v17, %v392_v14  ;;  %v413_v37 = vmul.f32 %v409_v21, %v397_v20 }
 0x133   :  { %384 = vst [vmem:[#allocation8 + $0x18] sm:$0xff] %v376_v27  ;;  %v428_v35 = vsub.f32 %v376_v27, %v390_v13  ;;  %388 = vst [vmem:[#allocation8 + $0x38] sm:$0xff] %v380_v28  ;;  %v430_v36 = vsub.f32 %v380_v28, %v392_v14 }
 0x134   :  { %v410_v34 = vmul.f32 %v406_v24, %v406_v24 }
 0x135   :  { %687 = shalt.err (!%p684_p5)
}
 0x136   :  { %s731_s10 = smov 256   ;;  %s732_s11 = smov 16   ;;  %v433_v40 = vmul.f32 %v429_v22, %v429_v22  ;;  %v414_v41 = vmul.f32 %v410_v34, %v399_v23  ;;  %v412_v42 = vmul.f32 %v408_v26, %v408_v26  ;;  %v432_v43 = vmul.f32 %v428_v35, %v428_v35 }
 0x137   :  { %461 = dma.vmem_to_hbm [thread:$0]  %s456_s5, 1024, %s822_s6, [#allocation4], %s731_s10, %s731_s10, %s732_s11   ;;  %v415_v44 = vmul.f32 %v411_v30, %v401_v29  ;;  %v404_v45 = vunpack.c.h.bf16 %v396_v25  ;;  %v435_v46 = vmul.f32 %v431_v33, %v398_v31  ;;  %v434_v49 = vmul.f32 %v430_v36, %v430_v36 }
 0x138   :  { %v417_v47 = vadd.f32 %v414_v41, %v413_v37  ;;  %v436_v48 = vmul.f32 %v432_v43, %v400_v32  ;;  %v437_v50 = vmul.f32 %v433_v40, %v402_v38  ;;  %v416_v51 = vmul.f32 %v412_v42, %v403_v39  ;;  %s733_s6 = smov [#allocation9]  }
 0x139   :  { %v438_v55 = vmul.f32 %v434_v49, %v404_v45  ;;  %s468_s14 = sshll.u32 %s733_s6, 4  ;;  %s469_s14 = int_to_ptr.vmem [resolvable:$true] %s468_s14 }
 0x13a   :  { %v418_v52 = vadd.f32 %v417_v47, %v415_v44  ;;  %v439_v53 = vadd.f32 %v436_v48, %v435_v46  ;;  %s696_s15 = scalar_lea.vmem %s469_s14, 16  ;;  %s700_s3 = scalar_lea.vmem %s469_s14, 32 }
 0x13b   :  { %p697_p6 = scmp.ne.s32.totalorder %s469_s14, %s696_s15  ;;  %p701_p7 = scmp.lt.s32.totalorder %s469_s14, %s469_s14 }
 0x13c   :  { %v419_v54 = vadd.f32 %v418_v52, %v416_v51  ;;  %v440_v56 = vadd.f32 %v439_v53, %v437_v50  ;;  %p702_p8 = scmp.lt.s32.totalorder %s700_s3, %s696_s15 }
 0x13e   :  { %v420_v57 = vrot.slane %v419_v54, 4  ;;  %v441_v58 = vadd.f32 %v440_v56, %v438_v55  ;;  %p703_p9 = por %p702_p8, %p701_p7 }
 0x140   :  { %v421_v59 = vadd.f32 %v420_v57, %v419_v54  ;;  %v442_v60 = vrot.slane %v441_v58, 4  ;;  %p704_p10 = pnand %p703_p9, %p697_p6 }
 0x142   :  { %v422_v61 = vrot.slane %v421_v59, 2  ;;  %v443_v62 = vadd.f32 %v442_v60, %v441_v58 }
 0x144   :  { %v423_v63 = vadd.f32 %v422_v61, %v421_v59  ;;  %v444_v0 = vrot.slane %v443_v62, 2 }
 0x146   :  { %v424_v1 = vrot.slane %v423_v63, 1  ;;  %v445_v2 = vadd.f32 %v444_v0, %v443_v62 }
 0x148   :  { %v446_v3 = vrot.slane %v445_v2, 1  ;;  %v425_v4 = vadd.f32 %v424_v1, %v423_v63 }
 0x14a   :  { %v447_v5 = vadd.f32 %v446_v3, %v445_v2 }
 0x14c   :  { %v448_v6 = vadd.f32 %v447_v5, %v425_v4 }
 0x14e   :  { %449 = vst [vmem:[#allocation9] sm:$0x1] %v448_v6 }
 0x14f   :  { %707 = shalt.err (!%p704_p10)
}
 0x150   :  { %471 = dma.vmem_to_hbm [thread:$0]  %s469_s14, 16, %s823_s7, [#allocation10]  }
 0x151   :  { %720 = dma.done.wait [#allocation4], 1024  }
 0x152   :  { %721 = vsyncadd [#allocation4], 4294966272 }
 0x153   :  { %722 = dma.done.wait [#allocation10], 16  }
 0x154   :  { %723 = vsyncadd [#allocation10], 4294967280 }
 0x155   :  { %478 = vsyncpa [#allocation3], 1 }
 0x156   :  { %479 = vsyncpa [#allocation6], 1 }
 0x157   :  { %480 = vsyncpa [#allocation4], 1 }
 0x158   :  { %481 = vsyncpa [#allocation10], 1 }

</bundles_post_ra>
